<compile_context>
chip_gen: v7x
topology: tpu7x:2x2x1
jax: 0.10.0
libtpu: 0.0.40
codegen_flags: <defaults>
</compile_context>

<pallas_src>
import jax
import jax.numpy as jnp
from jax.experimental import pallas as pl
from jax.experimental.pallas import tpu as pltpu


def _round_up(n, m):
    return ((n + m - 1) // m) * m


def _sigmoid(x):
    # exp on the EUP, reciprocal on the EUP (approx) -> keeps the VALU free.
    return pl.reciprocal(1.0 + jnp.exp(-x), approx=True)


def autoencoder_kernel(x_ref, w1_ref, b1_ref, w2_ref, b2_ref, o_ref):
    # Encoder: (TB, QP) @ (QP, KP) + (1, KP) -> sigmoid.  bf16 MXU, f32 acc.
    x = x_ref[...].astype(jnp.bfloat16)
    h = jnp.dot(x, w1_ref[...], preferred_element_type=jnp.float32)
    h = _sigmoid(h + b1_ref[...])
    # Decoder: (TB, KP) @ (KP, QP) + (1, QP) -> sigmoid.
    y = jnp.dot(h.astype(jnp.bfloat16), w2_ref[...],
                preferred_element_type=jnp.float32)
    o_ref[...] = _sigmoid(y + b2_ref[...]).astype(o_ref.dtype)


def _pick_tb(batch_rows, qp, kp, cap=1024, budget_bytes=24 << 20):
    """Pick the batch tile: largest multiple of 8 <= cap fitting the VMEM
    budget, then shrink if needed so the grid has >= 2 steps (v7x megacore)."""
    # Per-row VMEM: double-buffered x tile + double-buffered out tile (f32)
    # + f32 hidden + bf16 casts of x and hidden.
    per_row = 4 * (2 * qp) + 4 * (2 * qp) + 4 * kp + 2 * (qp + kp)
    weight_bytes = 2 * (2 * qp * kp) + 4 * (qp + kp)
    avail = max(budget_bytes - weight_bytes, per_row * 8)
    fit = (avail // per_row) // 8 * 8
    tb = min(cap, max(8, fit), _round_up(batch_rows, 8))
    # Guarantee >= 2 grid steps whenever the batch can be split (v7x has 2 TCs;
    # with a single step one of them idles).  v5e/v6e (1 TC) are unaffected.
    if batch_rows > 8 and pl.cdiv(batch_rows, tb) < 2:
        tb = max(8, _round_up(pl.cdiv(batch_rows, 2), 8))
    return tb


def autoencoder_forward(x, g_weight, g_bias, h_weight, h_bias, tb=None):
    """x: (B, Q) float32.  g_weight: (K, Q), g_bias: (K,),
    h_weight: (Q, K), h_bias: (Q,)  -- PyTorch nn.Linear conventions."""
    B, Q = x.shape
    K = g_weight.shape[0]

    QP = _round_up(Q, 128)
    KP = _round_up(K, 128)

    TB = _pick_tb(B, QP, KP) if tb is None else int(tb)
    grid = (pl.cdiv(B, TB),)

    # Weight prep (tiny, off the hot path): transpose to (in, out), zero-pad to
    # lane multiples, cast to bf16 for the MXU.  Zero-padded w2 rows / b2
    # entries mean the padded hidden/output lanes contribute nothing -> exact
    # on the valid slice (up to bf16 rounding of the real weights).
    w1 = jnp.zeros((QP, KP), jnp.float32).at[:Q, :K].set(g_weight.T)
    w1 = w1.astype(jnp.bfloat16)
    b1 = jnp.zeros((1, KP), jnp.float32).at[0, :K].set(g_bias)
    w2 = jnp.zeros((KP, QP), jnp.float32).at[:K, :Q].set(h_weight.T)
    w2 = w2.astype(jnp.bfloat16)
    b2 = jnp.zeros((1, QP), jnp.float32).at[0, :Q].set(h_bias)

    # x: NO batch padding (partial last block is masked by Pallas).  Lane pad
    # only if Q is not a multiple of 128, so garbage lanes can't enter the
    # contraction.  For Q=256 this is a pass-through (zero extra HBM traffic).
    if QP != Q:
        xk = jnp.zeros((B, QP), x.dtype).at[:, :Q].set(x)
    else:
        xk = x

    # Explicit, generation-aware VMEM request: footprint is a few MiB, so 32
    # MiB (>= v6e/v7x default, raises v5e's 16 MiB default) is plenty; capped
    # at 60 MiB to stay under v7x's 64 MiB physical VMEM per TensorCore.
    vmem_need = (w1.size * 2 + w2.size * 2 + (b1.size + b2.size) * 4
                 + 2 * TB * QP * 4          # double-buffered x tiles (f32)
                 + 2 * TB * QP * 4          # double-buffered out tiles (f32)
                 + TB * KP * 4              # f32 hidden
                 + TB * (QP + KP) * 2)      # bf16 casts of x and hidden
    vmem_limit = int(min(max(2 * vmem_need + (4 << 20), 32 << 20), 60 << 20))

    cost = pl.CostEstimate(
        flops=2 * 2 * B * QP * KP,                  # two matmuls
        transcendentals=B * (KP + QP),              # the two sigmoids
        bytes_accessed=4 * 2 * B * QP + 2 * 2 * QP * KP + 4 * (KP + QP),
    )

    out = pl.pallas_call(
        autoencoder_kernel,
        out_shape=jax.ShapeDtypeStruct((B, QP), jnp.float32),
        grid=grid,
        in_specs=[
            pl.BlockSpec((TB, QP), lambda i: (i, 0)),   # x: batch-tiled stream
            pl.BlockSpec((QP, KP), lambda i: (0, 0)),   # w1: VMEM-resident
            pl.BlockSpec((1, KP), lambda i: (0, 0)),    # b1: VMEM-resident
            pl.BlockSpec((KP, QP), lambda i: (0, 0)),   # w2: VMEM-resident
            pl.BlockSpec((1, QP), lambda i: (0, 0)),    # b2: VMEM-resident
        ],
        out_specs=pl.BlockSpec((TB, QP), lambda i: (i, 0)),
        compiler_params=pltpu.CompilerParams(
            dimension_semantics=("parallel",),          # megacore on v7x
            vmem_limit_bytes=vmem_limit),
        cost_estimate=cost,
    )(xk, w1, b1, w2, b2)

    return out if QP == Q else out[:, :Q]


def _ref_forward(x, g_weight, g_bias, h_weight, h_bias):
    h = jax.nn.sigmoid(x @ g_weight.T + g_bias)
    return jax.nn.sigmoid(h @ h_weight.T + h_bias)


if __name__ == "__main__":
    # Small synthetic config matching the module: num_question=256, k=100.
    Q, K = 256, 100

    key = jax.random.PRNGKey(0)
    kx, kx2, kw1, kb1, kw2, kb2 = jax.random.split(key, 6)

    # Deterministic PyTorch-style init: U(-1/sqrt(fan_in), 1/sqrt(fan_in)).
    g_bound = 1.0 / (Q ** 0.5)
    h_bound = 1.0 / (K ** 0.5)
    g_weight = jax.random.uniform(kw1, (K, Q), jnp.float32, -g_bound, g_bound)
    g_bias = jax.random.uniform(kb1, (K,), jnp.float32, -g_bound, g_bound)
    h_weight = jax.random.uniform(kw2, (Q, K), jnp.float32, -h_bound, h_bound)
    h_bias = jax.random.uniform(kb2, (Q,), jnp.float32, -h_bound, h_bound)

    # bf16 MXU path -> relaxed tolerance vs the f32 reference.
    TOL = 2e-2

    # Test 1: tiny batch (single grid step), "user vector" inputs in [0, 1].
    B1 = 8
    x1 = jax.random.uniform(kx, (B1, Q), jnp.float32)
    out1 = jax.block_until_ready(
        autoencoder_forward(x1, g_weight, g_bias, h_weight, h_bias))
    ref1 = _ref_forward(x1, g_weight, g_bias, h_weight, h_bias)
    assert out1.shape == (B1, Q)
    assert jnp.allclose(out1, ref1, atol=TOL, rtol=TOL)

    # Test 2: ragged batch, auto tile -> exercises the >=2-grid-step split and
    # the masked partial last block (no batch padding anywhere).
    B2 = 300
    x2 = jax.random.uniform(kx2, (B2, Q), jnp.float32)
    out2 = jax.block_until_ready(
        autoencoder_forward(x2, g_weight, g_bias, h_weight, h_bias))
    ref2 = _ref_forward(x2, g_weight, g_bias, h_weight, h_bias)
    assert out2.shape == (B2, Q)
    assert jnp.allclose(out2, ref2, atol=TOL, rtol=TOL)

    # Test 3: same batch with a forced small tile -> multi-step pipelined grid.
    out3 = jax.block_until_ready(
        autoencoder_forward(x2, g_weight, g_bias, h_weight, h_bias, tb=128))
    assert out3.shape == (B2, Q)
    assert jnp.allclose(out3, ref2, atol=TOL, rtol=TOL)

    print("KERNEL_OK")
</pallas_src>

<mosaic_0001>
module attributes {stable_mosaic.version = 11 : i64} {
  func.func @autoencoder_kernel(%arg0: i32, %arg1: memref<8x256xf32, #tpu.memory_space<vmem>>, %arg2: memref<256x128xbf16, #tpu.memory_space<vmem>>, %arg3: memref<1x128xf32, #tpu.memory_space<vmem>>, %arg4: memref<128x256xbf16, #tpu.memory_space<vmem>>, %arg5: memref<1x256xf32, #tpu.memory_space<vmem>>, %arg6: memref<8x256xf32, #tpu.memory_space<vmem>>) attributes {dimension_semantics = [#tpu.dimension_semantics<parallel>], iteration_bounds = array<i64: 1>, scalar_prefetch = 0 : i64, scratch_operands = 0 : i64, tpu.core_type = #tpu.core_type<tc>, window_params = [{transform_indices = @transform_0, window_bounds = array<i64: 8, 256>}, {pipeline_mode = #tpu.pipeline_mode<synchronous>, transform_indices = @transform_1, window_bounds = array<i64: 256, 128>}, {pipeline_mode = #tpu.pipeline_mode<synchronous>, transform_indices = @transform_2, window_bounds = array<i64: 1, 128>}, {pipeline_mode = #tpu.pipeline_mode<synchronous>, transform_indices = @transform_3, window_bounds = array<i64: 128, 256>}, {pipeline_mode = #tpu.pipeline_mode<synchronous>, transform_indices = @transform_4, window_bounds = array<i64: 1, 256>}, {transform_indices = @transform_5, window_bounds = array<i64: 8, 256>}]} {
    %c0 = arith.constant 0 : index
    %c0_0 = arith.constant 0 : index
    %0 = vector.load %arg1[%c0, %c0_0] : memref<8x256xf32, #tpu.memory_space<vmem>>, vector<8x256xf32>
    %1 = arith.truncf %0 : vector<8x256xf32> to vector<8x256xbf16>
    %c0_1 = arith.constant 0 : index
    %c0_2 = arith.constant 0 : index
    %2 = vector.load %arg2[%c0_1, %c0_2] : memref<256x128xbf16, #tpu.memory_space<vmem>>, vector<256x128xbf16>
    %cst = arith.constant dense<0.000000e+00> : vector<8x128xf32>
    %3 = tpu.matmul %1, %2, %cst {dimension_numbers = #tpu.dot_dimension_numbers<[1], [0], [0], [1], [0, 0, 1, 1], [], []>} : vector<8x256xbf16>, vector<256x128xbf16>, vector<8x128xf32> -> vector<8x128xf32>
    %c0_3 = arith.constant 0 : index
    %c0_4 = arith.constant 0 : index
    %4 = vector.load %arg3[%c0_3, %c0_4] : memref<1x128xf32, #tpu.memory_space<vmem>>, vector<1x128xf32>
    %5 = vector.broadcast %4 : vector<1x128xf32> to vector<8x128xf32>
    %6 = arith.addf %3, %5 : vector<8x128xf32>
    %cst_5 = arith.constant 0.000000e+00 : f32
    %7 = vector.broadcast %cst_5 : f32 to vector<8x128xf32>
    %8 = arith.subf %7, %6 : vector<8x128xf32>
    %9 = math.exp %8 : vector<8x128xf32>
    %cst_6 = arith.constant 1.000000e+00 : f32
    %10 = vector.broadcast %cst_6 : f32 to vector<8x128xf32>
    %11 = arith.addf %10, %9 : vector<8x128xf32>
    %12 = tpu.reciprocal %11 {approx = true} : vector<8x128xf32> -> vector<8x128xf32>
    %13 = arith.truncf %12 : vector<8x128xf32> to vector<8x128xbf16>
    %c0_7 = arith.constant 0 : index
    %c0_8 = arith.constant 0 : index
    %14 = vector.load %arg4[%c0_7, %c0_8] : memref<128x256xbf16, #tpu.memory_space<vmem>>, vector<128x256xbf16>
    %cst_9 = arith.constant dense<0.000000e+00> : vector<8x256xf32>
    %15 = tpu.matmul %13, %14, %cst_9 {dimension_numbers = #tpu.dot_dimension_numbers<[1], [0], [0], [1], [0, 0, 1, 1], [], []>} : vector<8x128xbf16>, vector<128x256xbf16>, vector<8x256xf32> -> vector<8x256xf32>
    %c0_10 = arith.constant 0 : index
    %c0_11 = arith.constant 0 : index
    %16 = vector.load %arg5[%c0_10, %c0_11] : memref<1x256xf32, #tpu.memory_space<vmem>>, vector<1x256xf32>
    %17 = vector.broadcast %16 : vector<1x256xf32> to vector<8x256xf32>
    %18 = arith.addf %15, %17 : vector<8x256xf32>
    %cst_12 = arith.constant 0.000000e+00 : f32
    %19 = vector.broadcast %cst_12 : f32 to vector<8x256xf32>
    %20 = arith.subf %19, %18 : vector<8x256xf32>
    %21 = math.exp %20 : vector<8x256xf32>
    %cst_13 = arith.constant 1.000000e+00 : f32
    %22 = vector.broadcast %cst_13 : f32 to vector<8x256xf32>
    %23 = arith.addf %22, %21 : vector<8x256xf32>
    %24 = tpu.reciprocal %23 {approx = true} : vector<8x256xf32> -> vector<8x256xf32>
    %c0_14 = arith.constant 0 : index
    %c0_15 = arith.constant 0 : index
    %25 = vector.load %arg6[%c0_14, %c0_15] : memref<8x256xf32, #tpu.memory_space<vmem>>, vector<8x256xf32>
    tpu.vector_store %arg6[%c0_14, %c0_15], %24 {strides = array<i32>} : memref<8x256xf32, #tpu.memory_space<vmem>>, vector<8x256xf32>,
    return
  }
  func.func @transform_0(%arg0: i32) -> (i32, i32) {
    %c0_i32 = arith.constant 0 : i32
    %c0_i32_0 = arith.constant 0 : i32
    return %arg0, %c0_i32 : i32, i32
  }
  func.func @transform_1(%arg0: i32) -> (i32, i32) {
    %c0_i32 = arith.constant 0 : i32
    %c0_i32_0 = arith.constant 0 : i32
    %c0_i32_1 = arith.constant 0 : i32
    return %c0_i32, %c0_i32_0 : i32, i32
  }
  func.func @transform_2(%arg0: i32) -> (i32, i32) {
    %c0_i32 = arith.constant 0 : i32
    %c0_i32_0 = arith.constant 0 : i32
    %c0_i32_1 = arith.constant 0 : i32
    return %c0_i32, %c0_i32_0 : i32, i32
  }
  func.func @transform_3(%arg0: i32) -> (i32, i32) {
    %c0_i32 = arith.constant 0 : i32
    %c0_i32_0 = arith.constant 0 : i32
    %c0_i32_1 = arith.constant 0 : i32
    return %c0_i32, %c0_i32_0 : i32, i32
  }
  func.func @transform_4(%arg0: i32) -> (i32, i32) {
    %c0_i32 = arith.constant 0 : i32
    %c0_i32_0 = arith.constant 0 : i32
    %c0_i32_1 = arith.constant 0 : i32
    return %c0_i32, %c0_i32_0 : i32, i32
  }
  func.func @transform_5(%arg0: i32) -> (i32, i32) {
    %c0_i32 = arith.constant 0 : i32
    %c0_i32_0 = arith.constant 0 : i32
    return %arg0, %c0_i32 : i32, i32
  }
}

</mosaic_0001>

<bundles_post_ra>
// kernel: tpu_custom_call.1
= control target key start
LH: loop header
LB: loop body
LE: loop exit
PB: predicated region body
PF: predicated region fallthrough
CT: control target
= control target key end

     0   :  { %10 = vsyncpa [#allocation3], 0  ;;  %s726_s0 = inlined_call_operand.hbm [shape: f32[8,256], index: 0, kind: input, shape index: {}]   ;;  %s727_s1 = inlined_call_operand.hbm [shape: bf16[256,128], index: 1, kind: input, shape index: {}]   ;;  %s728_s2 = inlined_call_operand.vmem [shape: f32[1,128], index: 2, kind: input, shape index: {}]   ;;  %s729_s3 = inlined_call_operand.hbm [shape: bf16[128,256], index: 3, kind: input, shape index: {}]   ;;  %s730_s4 = inlined_call_operand.vmem [shape: f32[1,256], index: 4, kind: input, shape index: {}]   ;;  %s731_s5 = inlined_call_operand.hbm [shape: f32[8,256], index: 5, kind: output, shape index: {}]  }
   0x1   :  { %11 = vsyncpa [#allocation6], 0 }
   0x2   :  { %12 = vsyncpa [#allocation4], 0  ;;  %s633_s18 = smov [#allocation5]   ;;  %s539_s22 = scalar_lea.hbm %s727_s1, 2048 }
   0x3   :  { %s28_s19 = sshll.u32 %s633_s18, 4  ;;  %p540_p0 = scmp.ne.s32.totalorder %s727_s1, %s539_s22  ;;  %s29_s19 = int_to_ptr.vmem [resolvable:$true] %s28_s19 }
   0x4   :  { %p543_p1 = scmp.lt.u32.totalorder %s539_s22, %s727_s1 }
   0x6   :  { %p545_p2 = pnand %p543_p1, %p540_p0 }
   0x8   :  { %548 = shalt.err (!%p545_p2)
}
   0x9   :  { %s549_s27 = scalar_lea.vmem %s29_s19, 2048  ;;  %p554_p4 = scmp.lt.s32.totalorder %s29_s19, %s29_s19 }
   0xa   :  { %p550_p3 = scmp.ne.s32.totalorder %s29_s19, %s549_s27  ;;  %p555_p5 = scmp.lt.s32.totalorder %s549_s27, %s549_s27 }
   0xc   :  { %p556_p6 = por %p555_p5, %p554_p4 }
   0xe   :  { %p557_p7 = pnand %p556_p6, %p550_p3 }
  0x10   :  { %560 = shalt.err (!%p557_p7)
}
  0x11   :  { %s634_s28 = smov 64   ;;  %s635_s29 = smov 4  }
  0x12   :  { %34 = dma.hbm_to_vmem [thread:$0]  %s727_s1, 2048, %s29_s19, [#allocation6], %s634_s28, %s634_s28, %s635_s29  }
  0x13   :  { %s636_s7 = smov [#allocation2]   ;;  %s637_s9 = smov [#allocation7]  }
  0x14   :  { %s19_s8 = sshll.u32 %s636_s7, 4  ;;  %s42_s10 = sshll.u32 %s637_s9, 4  ;;  %s20_s8 = int_to_ptr.vmem [resolvable:$true] %s19_s8  ;;  %s43_s10 = int_to_ptr.vmem [resolvable:$true] %s42_s10 }
  0x15   :  { %s561_s13 = scalar_lea.hbm %s726_s0, 256 }
  0x16   :  { %p562_p8 = scmp.ne.s32.totalorder %s726_s0, %s561_s13  ;;  %p565_p9 = scmp.lt.u32.totalorder %s561_s13, %s726_s0 }
  0x18   :  { %p567_p10 = pnand %p565_p9, %p562_p8 }
  0x1a   :  { %570 = shalt.err (!%p567_p10)
}
  0x1b   :  { %s571_s1 = scalar_lea.vmem %s20_s8, 256  ;;  %p576_p12 = scmp.lt.s32.totalorder %s20_s8, %s20_s8 }
  0x1c   :  { %p572_p11 = scmp.ne.s32.totalorder %s20_s8, %s571_s1  ;;  %p577_p13 = scmp.lt.s32.totalorder %s571_s1, %s571_s1 }
  0x1e   :  { %p578_p0 = por %p577_p13, %p576_p12 }
  0x20   :  { %p579_p1 = pnand %p578_p0, %p572_p11 }
  0x22   :  { %582 = shalt.err (!%p579_p1)
}
  0x23   :  { %22 = dma.hbm_to_vmem [thread:$0]  %s726_s0, 256, %s20_s8, [#allocation3]  }
  0x24   :  { %s583_s22 = scalar_lea.hbm %s729_s3, 2048 }
  0x25   :  { %p584_p2 = scmp.ne.s32.totalorder %s729_s3, %s583_s22  ;;  %p587_p3 = scmp.lt.u32.totalorder %s583_s22, %s729_s3 }
  0x27   :  { %p589_p4 = pnand %p587_p3, %p584_p2 }
  0x29   :  { %592 = shalt.err (!%p589_p4)
}
  0x2a   :  { %s593_s27 = scalar_lea.vmem %s43_s10, 2048  ;;  %p598_p6 = scmp.lt.s32.totalorder %s43_s10, %s43_s10 }
  0x2b   :  { %p594_p5 = scmp.ne.s32.totalorder %s43_s10, %s593_s27  ;;  %p599_p7 = scmp.lt.s32.totalorder %s593_s27, %s593_s27 }
  0x2d   :  { %p600_p8 = por %p599_p7, %p598_p6 }
  0x2f   :  { %p601_p9 = pnand %p600_p8, %p594_p5 }
  0x31   :  { %604 = shalt.err (!%p601_p9)
}
  0x32   :  { %s638_s0 = smov 128   ;;  %s639_s28 = smov 8  }
  0x33   :  { %48 = dma.hbm_to_vmem [thread:$0]  %s729_s3, 2048, %s43_s10, [#allocation6], %s638_s0, %s638_s0, %s639_s28  }
  0x34   :  { %627 = dma.done.wait [#allocation3], 256  }
  0x35   :  { %628 = vsyncadd [#allocation3], 4294967040 }
  0x36   :  { %629 = dma.done.wait [#allocation6], 4096  }
  0x37   :  { %630 = vsyncadd [#allocation6], 4294963200  ;;  %v487_v0 = vld [vmem:[#allocation5 + $0x40] sm:$0xff]   ;;  %v489_v2 = vld [vmem:[#allocation5 + $0x48] sm:$0xff]   ;;  %v640_v33 = vmov 0   ;;  %v264_v50 = vlaneseq }
  0x38   :  { %v488_v1 = vld [vmem:[#allocation5] sm:$0xff]   ;;  %456 = vmatprep.subr.bf16.mxu0 %v487_v0  ;;  %v490_v3 = vld [vmem:[#allocation5 + $0x8] sm:$0xff]   ;;  %v491_v4 = vld [vmem:[#allocation5 + $0x50] sm:$0xff]   ;;  %386 = vmatprep.mubr.bf16.mxu1 %v640_v33 }
  0x39   :  { %457 = vmatpush3.bf16.msra.mxu0 %v488_v1  ;;  %v492_v5 = vld [vmem:[#allocation5 + $0x10] sm:$0xff]   ;;  %v493_v6 = vld [vmem:[#allocation5 + $0x58] sm:$0xff]   ;;  %v495_v8 = vld [vmem:[#allocation5 + $0x60] sm:$0xff]   ;;  %v265_v51 = vshrl.u32 %v264_v50, 7 }
  0x3a   :  { %458 = vmatprep.subr.bf16.mxu0 %v489_v2  ;;  %v494_v7 = vld [vmem:[#allocation5 + $0x18] sm:$0xff]   ;;  %v496_v9 = vld [vmem:[#allocation5 + $0x20] sm:$0xff]   ;;  %v497_v10 = vld [vmem:[#allocation5 + $0x68] sm:$0xff]  }
  0x3b   :  { %v62_v11 = vld [vmem:[#allocation2 + $0x8] sm:$0xff]  ;;  %v498_v12 = vld [vmem:[#allocation5 + $0x28] sm:$0xff]   ;;  %v499_v14 = vld [vmem:[#allocation5 + $0x70] sm:$0xff]   ;;  %v266_v52 = vsub.s32 0, %v265_v51  ;;  %v270_v54 = vsub.s32 1, %v265_v51 }
  0x3c   :  { %v64_v13 = vpack.c.bf16 %v62_v11, %v62_v11  ;;  %v500_v15 = vld [vmem:[#allocation5 + $0x30] sm:$0xff]   ;;  %v501_v16 = vld [vmem:[#allocation5 + $0x78] sm:$0xff]   ;;  %v503_v20 = vld [vmem:[#allocation7 + $0x4] ss:$8 sps:$4 sm:$0xff]  }
  0x3d   :  { %459 = vmatpush3.bf16.msra.mxu0 %v490_v3  ;;  %v502_v17 = vld [vmem:[#allocation5 + $0x38] sm:$0xff]   ;;  %v61_v18 = vld [vmem:[#allocation2] sm:$0xff]  ;;  %v505_v21 = vld [vmem:[#allocation7] ss:$8 sps:$4 sm:$0xff]   ;;  %354 = vmatprep.subr.bf16.mxu1 %v503_v20 }
  0x3e   :  { %460 = vmatprep.subr.bf16.mxu0 %v491_v4  ;;  %232 = vmatprep.mubr.bf16.mxu0 %v64_v13  ;;  %v63_v19 = vpack.c.bf16 %v61_v18, %v61_v18  ;;  %v506_v22 = vld [vmem:[#allocation7 + $0x14] ss:$8 sps:$4 sm:$0xff]   ;;  %v508_v23 = vld [vmem:[#allocation7 + $0x10] ss:$8 sps:$4 sm:$0xff]   ;;  %v509_v24 = vld [vmem:[#allocation7 + $0x24] ss:$8 sps:$4 sm:$0xff]  }
  0x3f   :  { %355 = vmatpush1.bf16.msra.mxu1 %v505_v21  ;;  %v511_v25 = vld [vmem:[#allocation7 + $0x20] ss:$8 sps:$4 sm:$0xff]   ;;  %v512_v26 = vld [vmem:[#allocation7 + $0x34] ss:$8 sps:$4 sm:$0xff]   ;;  %v514_v27 = vld [vmem:[#allocation7 + $0x30] ss:$8 sps:$4 sm:$0xff]  }
  0x40   :  { %356 = vmatprep.subr.bf16.mxu1 %v506_v22  ;;  %v515_v28 = vld [vmem:[#allocation7 + $0x44] ss:$8 sps:$4 sm:$0xff]   ;;  %v517_v29 = vld [vmem:[#allocation7 + $0x40] ss:$8 sps:$4 sm:$0xff]   ;;  %v518_v30 = vld [vmem:[#allocation7 + $0x54] ss:$8 sps:$4 sm:$0xff]  }
  0x41   :  { %461 = vmatpush3.bf16.msra.mxu0 %v492_v5  ;;  %v520_v31 = vld [vmem:[#allocation7 + $0x50] ss:$8 sps:$4 sm:$0xff]   ;;  %v521_v32 = vld [vmem:[#allocation7 + $0x64] ss:$8 sps:$4 sm:$0xff]   ;;  %v523_v34 = vld [vmem:[#allocation7 + $0x60] ss:$8 sps:$4 sm:$0xff]  }
  0x42   :  { %462 = vmatprep.subr.bf16.mxu0 %v493_v6  ;;  %v524_v35 = vld [vmem:[#allocation7 + $0x74] ss:$8 sps:$4 sm:$0xff]   ;;  %v526_v36 = vld [vmem:[#allocation7 + $0x70] ss:$8 sps:$4 sm:$0xff]  }
  0x43   :  { %357 = vmatpush1.bf16.msra.mxu1 %v508_v23  ;;  %v423_v38 = vld [vmem:[%s728_s2] ss:$0 sm:$0xff]  ;;  %s641_s2 = smov [#allocation8]  }
  0x44   :  { %358 = vmatprep.subr.bf16.mxu1 %v509_v24  ;;  %v262_v53 = vld [vmem:[%s730_s4] sm:$0x3]  ;;  %s413_s4 = sshll.u32 %s641_s2, 4  ;;  %s414_s4 = int_to_ptr.vmem [resolvable:$true] %s413_s4 }
  0x45   :  { %463 = vmatpush3.bf16.msra.mxu0 %v494_v7  ;;  %v267_v55 = vrot.slane %v262_v53, %v266_v52  ;;  %v271_v56 = vrot.slane %v262_v53, %v270_v54  ;;  %s605_s9 = scalar_lea.vmem %s414_s4, 256  ;;  %p610_p11 = scmp.lt.s32.totalorder %s414_s4, %s414_s4 }
  0x46   :  { %464 = vmatprep.subr.bf16.mxu0 %v495_v8  ;;  %p606_p10 = scmp.ne.s32.totalorder %s414_s4, %s605_s9  ;;  %p611_p12 = scmp.lt.s32.totalorder %s605_s9, %s605_s9 }
  0x47   :  { %359 = vmatpush1.bf16.msra.mxu1 %v511_v25 }
  0x48   :  { %360 = vmatprep.subr.bf16.mxu1 %v512_v26  ;;  %p612_p13 = por %p611_p12, %p610_p11 }
  0x49   :  { %465 = vmatpush3.bf16.msra.mxu0 %v496_v9 }
  0x4a   :  { %466 = vmatprep.subr.bf16.mxu0 %v497_v10  ;;  %p613_p0 = pnand %p612_p13, %p606_p10 }
  0x4b   :  { %361 = vmatpush1.bf16.msra.mxu1 %v514_v27 }
  0x4c   :  { %362 = vmatprep.subr.bf16.mxu1 %v515_v28 }
  0x4d   :  { %467 = vmatpush3.bf16.msra.mxu0 %v498_v12 }
  0x4e   :  { %468 = vmatprep.subr.bf16.mxu0 %v499_v14 }
  0x4f   :  { %363 = vmatpush1.bf16.msra.mxu1 %v517_v29 }
  0x50   :  { %364 = vmatprep.subr.bf16.mxu1 %v518_v30 }
  0x51   :  { %469 = vmatpush3.bf16.msra.mxu0 %v500_v15 }
  0x52   :  { %470 = vmatprep.subr.bf16.mxu0 %v501_v16 }
  0x53   :  { %365 = vmatpush1.bf16.msra.mxu1 %v520_v31 }
  0x54   :  { %366 = vmatprep.subr.bf16.mxu1 %v521_v32 }
  0x55   :  { %471 = vmatpush3.bf16.msra.mxu0 %v502_v17 }
  0x57   :  { %367 = vmatpush1.bf16.msra.mxu1 %v523_v34 }
  0x58   :  { %233 = vmatmul.mubr.bf16.vlgmr.msra.gmra.mrb[0].mxu0 %v63_v19  ;;  %368 = vmatprep.subr.bf16.mxu1 %v524_v35 }
  0x5b   :  { %369 = vmatpush1.bf16.msra.mxu1 %v526_v36 }
 0x12b   :  { %v472_v37 = vpop.f32.mrb[0].mxu0 }
 0x12c   :  { %v473_v39 = vpop.f32.mrb[1].mxu0 }
 0x12d   :  { %v474_v40 = vadd.f32 %v473_v39, %v472_v37  ;;  %v475_v41 = vpop.f32.mrb[2].mxu0 }
 0x12e   :  { %v476_v42 = vpop.f32.mrb[3].mxu0 }
 0x12f   :  { %v235_v43 = vadd.f32 %v474_v40, %v423_v38 }
 0x131   :  { %v240_v44 = vsub.f32 0.0, %v235_v43 }
 0x133   :  { %v241_v45 = vmul.f32 1.442695, %v240_v44 }
 0x135   :  { %527 = vpow2.f32 %v241_v45 }
 0x13f   :  { %v528_v46 = vpop.eup %527 }
 0x140   :  { %v243_v47 = vadd.f32 1.0, %v528_v46 }
 0x142   :  { %529 = vrcp.f32 %v243_v47 }
 0x14c   :  { %v530_v48 = vpop.eup %529 }
 0x14d   :  { %v245_v49 = vpack.c.bf16 %v530_v48, %v530_v48 }
 0x14f   :  { %387 = vmatmul.mubr.bf16.vlgmr.msra.gmra.mrb[0].mxu1 %v245_v49 }
 0x222   :  { %v388_v57 = vpop.f32.mrb[0].mxu1 }
 0x223   :  { %v389_v58 = vadd.f32 %v388_v57, %v267_v55  ;;  %v390_v59 = vpop.f32.mrb[1].mxu1 }
 0x224   :  { %v391_v60 = vadd.f32 %v390_v59, %v271_v56  ;;  %v392_v61 = vpop.f32.mrb[2].mxu1 }
 0x225   :  { %v395_v62 = vsub.f32 0.0, %v389_v58  ;;  %v393_v63 = vpop.f32.mrb[3].mxu1 }
 0x226   :  { %v396_v0 = vsub.f32 0.0, %v391_v60 }
 0x227   :  { %v397_v1 = vmul.f32 1.442695, %v395_v62 }
 0x228   :  { %v399_v2 = vmul.f32 1.442695, %v396_v0 }
 0x229   :  { %531 = vpow2.f32 %v397_v1 }
 0x22a   :  { %533 = vpow2.f32 %v399_v2 }
 0x233   :  { %v532_v3 = vpop.eup %531 }
 0x234   :  { %v534_v4 = vpop.eup %533  ;;  %v401_v5 = vadd.f32 1.0, %v532_v3 }
 0x235   :  { %v402_v6 = vadd.f32 1.0, %v534_v4 }
 0x236   :  { %535 = vrcp.f32 %v401_v5 }
 0x237   :  { %537 = vrcp.f32 %v402_v6 }
 0x240   :  { %v536_v7 = vpop.eup %535 }
 0x241   :  { %v538_v8 = vpop.eup %537  ;;  %405 = vst [vmem:[#allocation8] sm:$0xff] %v536_v7 }
 0x242   :  { %406 = vst [vmem:[#allocation8 + $0x8] sm:$0xff] %v538_v8 }
 0x243   :  { %616 = shalt.err (!%p613_p0)
}
 0x244   :  { %s617_s12 = scalar_lea.hbm %s731_s5, 256 }
 0x245   :  { %p618_p1 = scmp.ne.s32.totalorder %s731_s5, %s617_s12  ;;  %p621_p2 = scmp.lt.u32.totalorder %s617_s12, %s731_s5 }
 0x247   :  { %p623_p3 = pnand %p621_p2, %p618_p1 }
 0x249   :  { %626 = shalt.err (!%p623_p3)
}
 0x24a   :  { %416 = dma.vmem_to_hbm [thread:$0]  %s414_s4, 256, %s731_s5, [#allocation4]  }
 0x24b   :  { %631 = dma.done.wait [#allocation4], 256  }
 0x24c   :  { %632 = vsyncadd [#allocation4], 4294967040 }
 0x24d   :  { %420 = vsyncpa [#allocation3], 1 }
 0x24e   :  { %421 = vsyncpa [#allocation6], 1 }
 0x24f   :  { %422 = vsyncpa [#allocation4], 1 }

</bundles_post_ra>
